<compile_context>
chip_gen: v7x
topology: tpu7x:2x2x1
jax: 0.10.0
libtpu: 0.0.40
codegen_flags: <defaults>
</compile_context>

<pallas_src>
import jax
import jax.numpy as jnp
import numpy as np
from jax import lax
from jax.experimental import pallas as pl
from jax.experimental.pallas import tpu as pltpu

DIM_IN = 4
DIM_HIDDEN = 32
DIM_OUT = 4          # must equal DIM_IN (Normalization feeds INR's output back into INR)
XRANGE = 1.0
TM_MAX = 8192        # lane-tile (points) upper bound; lane-dense tiles stay small in VMEM


# ---------------------------------------------------------------------------
# Pallas kernel: fused Composition forward on one lane tile of points.
# Layout: activations are (D, TM) — features on sublanes, points on lanes.
# Weights are pre-transposed to (d_out, d_in), biases to (d_out, 1).
# ---------------------------------------------------------------------------
def composition_kernel(x_ref, w0_ref, b0_ref, w1_ref, b1_ref, w2_ref, b2_ref, o_ref):
    w0, b0 = w0_ref[...], b0_ref[...]      # (H, Din),  (H, 1)
    w1, b1 = w1_ref[...], b1_ref[...]      # (H, H),    (H, 1)
    w2, b2 = w2_ref[...], b2_ref[...]      # (Dout, H), (Dout, 1)

    def mlp_head(z):                        # (Din, cols) -> (H, cols)
        h = jnp.tanh(jnp.dot(w0, z, preferred_element_type=jnp.float32) + b0)
        return jnp.tanh(jnp.dot(w1, h, preferred_element_type=jnp.float32) + b1)

    def inr(z):                             # full INR: (Din, cols) -> (Dout, cols)
        return jnp.dot(w2, mlp_head(z), preferred_element_type=jnp.float32) + b2

    # Normalization constants: INR(+/- xrange) computed in-kernel (two 1-column
    # MLPs — a handful of tiny MXU pushes per grid step), then folded into the
    # last linear layer of the second pass:
    #   w2n = w2 * (2/ygap),  b2n = (b2 - ymin) * (2/ygap) - 1
    ones = jnp.full((DIM_IN, 1), XRANGE, jnp.float32)
    ymax = inr(ones)                        # (Dout, 1)
    ymin = inr(-ones)                       # (Dout, 1)
    scale = 2.0 / (ymax - ymin)             # (Dout, 1)
    w2n = w2 * scale                        # (Dout, H)
    b2n = (b2 - ymin) * scale - 1.0         # (Dout, 1)

    # Pass 1: x1 = INR(x) — stays in vregs/VMEM, never touches HBM.
    x1 = inr(x_ref[...])                    # (Dout, TM)
    # Pass 2: normalized INR(x1), normalization folded into w2n/b2n.
    o_ref[...] = (jnp.dot(w2n, mlp_head(x1), preferred_element_type=jnp.float32)
                  + b2n).astype(o_ref.dtype)


# ---------------------------------------------------------------------------
# Tiling helpers
# ---------------------------------------------------------------------------
def _num_tensorcores():
    """Best-effort TensorCore count per device (v7x: 2, v5e/v6e: 1). Falls back
    to 1 if unavailable (safe: only skips the multi-core even-split heuristic)."""
    try:
        d = jax.devices()[0]
    except Exception:
        return 1
    for attr in ("num_cores", "core_count"):
        v = getattr(d, attr, None)
        if isinstance(v, int) and v > 0:
            return int(v)
    return 1


def _choose_tm(n, num_cores):
    """Lane tile over the point dimension.
      * 1-TC chips (v5e/v6e) or tiny n: one full-extent block (no forced split).
      * multi-TC chips (v7x): even, 128-aligned split so both cores stay busy.
      * cap at TM_MAX (amortizes ~0.35us/step; lane-dense tiles are tiny in VMEM)."""
    if num_cores <= 1 or n <= 128:
        return min(n, TM_MAX)          # full-extent block when n <= TM_MAX (no 128 rule)
    per_core = pl.cdiv(n, num_cores)
    tm = ((per_core + 127) // 128) * 128
    return max(128, min(TM_MAX, tm))


# ---------------------------------------------------------------------------
# Wrapper
# ---------------------------------------------------------------------------
@jax.jit
def composition_forward(x, w0, b0, w1, b1, w2, b2):
    """Composition.forward: INR -> Normalization(INR, .), one fused pallas_call.
    x: (N, DIM_IN) f32; weights in PyTorch-equivalent (d_in, d_out)/(1, d_out) layout."""
    n = x.shape[0]
    tm = _choose_tm(n, _num_tensorcores())
    grid = (pl.cdiv(n, tm),)

    # Lane-dense layout: features on sublanes, points on lanes.  Transposes are
    # cheap wrapper-side layout plumbing (arrays are only 4 features wide).
    xt = x.T                                   # (Din, N)
    w0t, b0t = w0.T, b0.T                      # (H, Din), (H, 1)
    w1t, b1t = w1.T, b1.T                      # (H, H),   (H, 1)
    w2t, b2t = w2.T, b2.T                      # (Dout,H), (Dout,1)
    weights = (w0t, b0t, w1t, b1t, w2t, b2t)

    in_specs = [pl.BlockSpec((DIM_IN, tm), lambda i: (0, i))]
    in_specs += [pl.BlockSpec(p.shape, lambda i, _z=(0,) * p.ndim: _z) for p in weights]

    out_t = pl.pallas_call(
        composition_kernel,
        out_shape=jax.ShapeDtypeStruct((DIM_OUT, n), jnp.float32),
        grid=grid,
        in_specs=in_specs,
        out_specs=pl.BlockSpec((DIM_OUT, tm), lambda i: (0, i)),
        compiler_params=pltpu.CompilerParams(dimension_semantics=("parallel",)),
    )(xt, *weights)
    return out_t.T                             # back to (N, DIM_OUT)


# ---------------------------------------------------------------------------
# Pure-JAX reference (mirrors the PyTorch semantics exactly, no folding)
# ---------------------------------------------------------------------------
def _mlp_xla(x, params, precision=lax.Precision.HIGHEST):
    w0, b0, w1, b1, w2, b2 = params
    h = jnp.tanh(jnp.dot(x, w0, precision=precision) + b0)
    h = jnp.tanh(jnp.dot(h, w1, precision=precision) + b1)
    return jnp.dot(h, w2, precision=precision) + b2


def _ref_composition(x, params):
    x1 = _mlp_xla(x, params)
    xmax = jnp.ones((1, DIM_OUT), jnp.float32) * XRANGE
    xmin = -jnp.ones((1, DIM_OUT), jnp.float32) * XRANGE
    ymax = _mlp_xla(xmax, params)
    ymin = _mlp_xla(xmin, params)
    return (_mlp_xla(x1, params) - ymin) / (ymax - ymin) * 2.0 - 1.0


# ---------------------------------------------------------------------------
def _init_params(key):
    """Deterministic PyTorch-Linear-style init: U(-1/sqrt(fan_in), +1/sqrt(fan_in))."""
    ks = jax.random.split(key, 6)

    def lin(kw, kb, fan_in, fan_out):
        bound = 1.0 / np.sqrt(fan_in)
        w = jax.random.uniform(kw, (fan_in, fan_out), jnp.float32, -bound, bound)
        b = jax.random.uniform(kb, (1, fan_out), jnp.float32, -bound, bound)
        return w, b

    w0, b0 = lin(ks[0], ks[1], DIM_IN, DIM_HIDDEN)
    w1, b1 = lin(ks[2], ks[3], DIM_HIDDEN, DIM_HIDDEN)
    w2, b2 = lin(ks[4], ks[5], DIM_HIDDEN, DIM_OUT)
    return w0, b0, w1, b1, w2, b2


if __name__ == "__main__":
    key = jax.random.PRNGKey(0)
    kx, kp = jax.random.split(key)

    n_points = 256
    x = jax.random.uniform(kx, (n_points, DIM_IN), jnp.float32, -1.0, 1.0)
    params = _init_params(kp)

    out = jax.block_until_ready(composition_forward(x, *params))

    ref = _ref_composition(x, params)
    # Folding 2/ygap into w2/b2 is mathematically exact but reassociates f32 ops.
    np.testing.assert_allclose(np.asarray(out), np.asarray(ref), rtol=1e-3, atol=1e-3)

    print("KERNEL_OK")
</pallas_src>

<mosaic_0001>
module attributes {stable_mosaic.version = 11 : i64} {
  func.func @composition_kernel(%arg0: i32, %arg1: memref<4x256xf32, #tpu.memory_space<vmem>>, %arg2: memref<32x4xf32, #tpu.memory_space<vmem>>, %arg3: memref<32x1xf32, #tpu.memory_space<vmem>>, %arg4: memref<32x32xf32, #tpu.memory_space<vmem>>, %arg5: memref<32x1xf32, #tpu.memory_space<vmem>>, %arg6: memref<4x32xf32, #tpu.memory_space<vmem>>, %arg7: memref<4x1xf32, #tpu.memory_space<vmem>>, %arg8: memref<4x256xf32, #tpu.memory_space<vmem>>) attributes {dimension_semantics = [#tpu.dimension_semantics<parallel>], iteration_bounds = array<i64: 1>, scalar_prefetch = 0 : i64, scratch_operands = 0 : i64, tpu.core_type = #tpu.core_type<tc>, window_params = [{transform_indices = @transform_0, window_bounds = array<i64: 4, 256>}, {pipeline_mode = #tpu.pipeline_mode<synchronous>, transform_indices = @transform_1, window_bounds = array<i64: 32, 4>}, {pipeline_mode = #tpu.pipeline_mode<synchronous>, transform_indices = @transform_2, window_bounds = array<i64: 32, 1>}, {pipeline_mode = #tpu.pipeline_mode<synchronous>, transform_indices = @transform_3, window_bounds = array<i64: 32, 32>}, {pipeline_mode = #tpu.pipeline_mode<synchronous>, transform_indices = @transform_4, window_bounds = array<i64: 32, 1>}, {pipeline_mode = #tpu.pipeline_mode<synchronous>, transform_indices = @transform_5, window_bounds = array<i64: 4, 32>}, {pipeline_mode = #tpu.pipeline_mode<synchronous>, transform_indices = @transform_6, window_bounds = array<i64: 4, 1>}, {transform_indices = @transform_7, window_bounds = array<i64: 4, 256>}]} {
    %c0 = arith.constant 0 : index
    %c0_0 = arith.constant 0 : index
    %0 = vector.load %arg2[%c0, %c0_0] : memref<32x4xf32, #tpu.memory_space<vmem>>, vector<32x4xf32>
    %c0_1 = arith.constant 0 : index
    %c0_2 = arith.constant 0 : index
    %1 = vector.load %arg3[%c0_1, %c0_2] : memref<32x1xf32, #tpu.memory_space<vmem>>, vector<32x1xf32>
    %c0_3 = arith.constant 0 : index
    %c0_4 = arith.constant 0 : index
    %2 = vector.load %arg4[%c0_3, %c0_4] : memref<32x32xf32, #tpu.memory_space<vmem>>, vector<32x32xf32>
    %c0_5 = arith.constant 0 : index
    %c0_6 = arith.constant 0 : index
    %3 = vector.load %arg5[%c0_5, %c0_6] : memref<32x1xf32, #tpu.memory_space<vmem>>, vector<32x1xf32>
    %c0_7 = arith.constant 0 : index
    %c0_8 = arith.constant 0 : index
    %4 = vector.load %arg6[%c0_7, %c0_8] : memref<4x32xf32, #tpu.memory_space<vmem>>, vector<4x32xf32>
    %c0_9 = arith.constant 0 : index
    %c0_10 = arith.constant 0 : index
    %5 = vector.load %arg7[%c0_9, %c0_10] : memref<4x1xf32, #tpu.memory_space<vmem>>, vector<4x1xf32>
    %cst = arith.constant 1.000000e+00 : f32
    %6 = vector.broadcast %cst : f32 to vector<4x1xf32>
    %cst_11 = arith.constant dense<0.000000e+00> : vector<32x1xf32>
    %7 = tpu.matmul %0, %6, %cst_11 {dimension_numbers = #tpu.dot_dimension_numbers<[1], [0], [0], [1], [0, 0, 1, 1], [], []>} : vector<32x4xf32>, vector<4x1xf32>, vector<32x1xf32> -> vector<32x1xf32>
    %8 = arith.addf %7, %1 : vector<32x1xf32>
    %9 = math.tanh %8 : vector<32x1xf32>
    %cst_12 = arith.constant dense<0.000000e+00> : vector<32x1xf32>
    %10 = tpu.matmul %2, %9, %cst_12 {dimension_numbers = #tpu.dot_dimension_numbers<[1], [0], [0], [1], [0, 0, 1, 1], [], []>} : vector<32x32xf32>, vector<32x1xf32>, vector<32x1xf32> -> vector<32x1xf32>
    %11 = arith.addf %10, %3 : vector<32x1xf32>
    %12 = math.tanh %11 : vector<32x1xf32>
    %cst_13 = arith.constant dense<0.000000e+00> : vector<4x1xf32>
    %13 = tpu.matmul %4, %12, %cst_13 {dimension_numbers = #tpu.dot_dimension_numbers<[1], [0], [0], [1], [0, 0, 1, 1], [], []>} : vector<4x32xf32>, vector<32x1xf32>, vector<4x1xf32> -> vector<4x1xf32>
    %14 = arith.addf %13, %5 : vector<4x1xf32>
    %cst_14 = arith.constant 0.000000e+00 : f32
    %15 = vector.broadcast %cst_14 : f32 to vector<4x1xf32>
    %16 = arith.subf %15, %6 : vector<4x1xf32>
    %cst_15 = arith.constant dense<0.000000e+00> : vector<32x1xf32>
    %17 = tpu.matmul %0, %16, %cst_15 {dimension_numbers = #tpu.dot_dimension_numbers<[1], [0], [0], [1], [0, 0, 1, 1], [], []>} : vector<32x4xf32>, vector<4x1xf32>, vector<32x1xf32> -> vector<32x1xf32>
    %18 = arith.addf %17, %1 : vector<32x1xf32>
    %19 = math.tanh %18 : vector<32x1xf32>
    %cst_16 = arith.constant dense<0.000000e+00> : vector<32x1xf32>
    %20 = tpu.matmul %2, %19, %cst_16 {dimension_numbers = #tpu.dot_dimension_numbers<[1], [0], [0], [1], [0, 0, 1, 1], [], []>} : vector<32x32xf32>, vector<32x1xf32>, vector<32x1xf32> -> vector<32x1xf32>
    %21 = arith.addf %20, %3 : vector<32x1xf32>
    %22 = math.tanh %21 : vector<32x1xf32>
    %cst_17 = arith.constant dense<0.000000e+00> : vector<4x1xf32>
    %23 = tpu.matmul %4, %22, %cst_17 {dimension_numbers = #tpu.dot_dimension_numbers<[1], [0], [0], [1], [0, 0, 1, 1], [], []>} : vector<4x32xf32>, vector<32x1xf32>, vector<4x1xf32> -> vector<4x1xf32>
    %24 = arith.addf %23, %5 : vector<4x1xf32>
    %25 = arith.subf %14, %24 : vector<4x1xf32>
    %cst_18 = arith.constant 2.000000e+00 : f32
    %26 = vector.broadcast %cst_18 : f32 to vector<4x1xf32>
    %27 = arith.divf %26, %25 : vector<4x1xf32>
    %28 = vector.broadcast %27 : vector<4x1xf32> to vector<4x32xf32>
    %29 = arith.mulf %4, %28 : vector<4x32xf32>
    %30 = arith.subf %5, %24 : vector<4x1xf32>
    %31 = arith.mulf %30, %27 : vector<4x1xf32>
    %cst_19 = arith.constant 1.000000e+00 : f32
    %32 = vector.broadcast %cst_19 : f32 to vector<4x1xf32>
    %33 = arith.subf %31, %32 : vector<4x1xf32>
    %c0_20 = arith.constant 0 : index
    %c0_21 = arith.constant 0 : index
    %34 = vector.load %arg1[%c0_20, %c0_21] : memref<4x256xf32, #tpu.memory_space<vmem>>, vector<4x256xf32>
    %cst_22 = arith.constant dense<0.000000e+00> : vector<32x256xf32>
    %35 = tpu.matmul %0, %34, %cst_22 {dimension_numbers = #tpu.dot_dimension_numbers<[1], [0], [0], [1], [0, 0, 1, 1], [], []>} : vector<32x4xf32>, vector<4x256xf32>, vector<32x256xf32> -> vector<32x256xf32>
    %36 = vector.broadcast %1 : vector<32x1xf32> to vector<32x256xf32>
    %37 = arith.addf %35, %36 : vector<32x256xf32>
    %38 = math.tanh %37 : vector<32x256xf32>
    %cst_23 = arith.constant dense<0.000000e+00> : vector<32x256xf32>
    %39 = tpu.matmul %2, %38, %cst_23 {dimension_numbers = #tpu.dot_dimension_numbers<[1], [0], [0], [1], [0, 0, 1, 1], [], []>} : vector<32x32xf32>, vector<32x256xf32>, vector<32x256xf32> -> vector<32x256xf32>
    %40 = vector.broadcast %3 : vector<32x1xf32> to vector<32x256xf32>
    %41 = arith.addf %39, %40 : vector<32x256xf32>
    %42 = math.tanh %41 : vector<32x256xf32>
    %cst_24 = arith.constant dense<0.000000e+00> : vector<4x256xf32>
    %43 = tpu.matmul %4, %42, %cst_24 {dimension_numbers = #tpu.dot_dimension_numbers<[1], [0], [0], [1], [0, 0, 1, 1], [], []>} : vector<4x32xf32>, vector<32x256xf32>, vector<4x256xf32> -> vector<4x256xf32>
    %44 = vector.broadcast %5 : vector<4x1xf32> to vector<4x256xf32>
    %45 = arith.addf %43, %44 : vector<4x256xf32>
    %cst_25 = arith.constant dense<0.000000e+00> : vector<32x256xf32>
    %46 = tpu.matmul %0, %45, %cst_25 {dimension_numbers = #tpu.dot_dimension_numbers<[1], [0], [0], [1], [0, 0, 1, 1], [], []>} : vector<32x4xf32>, vector<4x256xf32>, vector<32x256xf32> -> vector<32x256xf32>
    %47 = vector.broadcast %1 : vector<32x1xf32> to vector<32x256xf32>
    %48 = arith.addf %46, %47 : vector<32x256xf32>
    %49 = math.tanh %48 : vector<32x256xf32>
    %cst_26 = arith.constant dense<0.000000e+00> : vector<32x256xf32>
    %50 = tpu.matmul %2, %49, %cst_26 {dimension_numbers = #tpu.dot_dimension_numbers<[1], [0], [0], [1], [0, 0, 1, 1], [], []>} : vector<32x32xf32>, vector<32x256xf32>, vector<32x256xf32> -> vector<32x256xf32>
    %51 = vector.broadcast %3 : vector<32x1xf32> to vector<32x256xf32>
    %52 = arith.addf %50, %51 : vector<32x256xf32>
    %53 = math.tanh %52 : vector<32x256xf32>
    %cst_27 = arith.constant dense<0.000000e+00> : vector<4x256xf32>
    %54 = tpu.matmul %29, %53, %cst_27 {dimension_numbers = #tpu.dot_dimension_numbers<[1], [0], [0], [1], [0, 0, 1, 1], [], []>} : vector<4x32xf32>, vector<32x256xf32>, vector<4x256xf32> -> vector<4x256xf32>
    %55 = vector.broadcast %33 : vector<4x1xf32> to vector<4x256xf32>
    %56 = arith.addf %54, %55 : vector<4x256xf32>
    %c0_28 = arith.constant 0 : index
    %c0_29 = arith.constant 0 : index
    %57 = vector.load %arg8[%c0_28, %c0_29] : memref<4x256xf32, #tpu.memory_space<vmem>>, vector<4x256xf32>
    tpu.vector_store %arg8[%c0_28, %c0_29], %56 {strides = array<i32>} : memref<4x256xf32, #tpu.memory_space<vmem>>, vector<4x256xf32>,
    return
  }
  func.func @transform_0(%arg0: i32) -> (i32, i32) {
    %c0_i32 = arith.constant 0 : i32
    %c0_i32_0 = arith.constant 0 : i32
    return %c0_i32, %arg0 : i32, i32
  }
  func.func @transform_1(%arg0: i32) -> (i32, i32) {
    %c0_i32 = arith.constant 0 : i32
    %c0_i32_0 = arith.constant 0 : i32
    %c0_i32_1 = arith.constant 0 : i32
    return %c0_i32, %c0_i32_0 : i32, i32
  }
  func.func @transform_2(%arg0: i32) -> (i32, i32) {
    %c0_i32 = arith.constant 0 : i32
    %c0_i32_0 = arith.constant 0 : i32
    %c0_i32_1 = arith.constant 0 : i32
    return %c0_i32, %c0_i32_0 : i32, i32
  }
  func.func @transform_3(%arg0: i32) -> (i32, i32) {
    %c0_i32 = arith.constant 0 : i32
    %c0_i32_0 = arith.constant 0 : i32
    %c0_i32_1 = arith.constant 0 : i32
    return %c0_i32, %c0_i32_0 : i32, i32
  }
  func.func @transform_4(%arg0: i32) -> (i32, i32) {
    %c0_i32 = arith.constant 0 : i32
    %c0_i32_0 = arith.constant 0 : i32
    %c0_i32_1 = arith.constant 0 : i32
    return %c0_i32, %c0_i32_0 : i32, i32
  }
  func.func @transform_5(%arg0: i32) -> (i32, i32) {
    %c0_i32 = arith.constant 0 : i32
    %c0_i32_0 = arith.constant 0 : i32
    %c0_i32_1 = arith.constant 0 : i32
    return %c0_i32, %c0_i32_0 : i32, i32
  }
  func.func @transform_6(%arg0: i32) -> (i32, i32) {
    %c0_i32 = arith.constant 0 : i32
    %c0_i32_0 = arith.constant 0 : i32
    %c0_i32_1 = arith.constant 0 : i32
    return %c0_i32, %c0_i32_0 : i32, i32
  }
  func.func @transform_7(%arg0: i32) -> (i32, i32) {
    %c0_i32 = arith.constant 0 : i32
    %c0_i32_0 = arith.constant 0 : i32
    return %c0_i32, %arg0 : i32, i32
  }
}

</mosaic_0001>

<bundles_post_ra>
// kernel: composition_forward.1
= control target key start
LH: loop header
LB: loop body
LE: loop exit
PB: predicated region body
PF: predicated region fallthrough
CT: control target
= control target key end

     0   :  { %vm58_vm0 = vcmask 1043456   ;;  %vm45_vm1 = vcmask 31744   ;;  %v1541_v2 = vmov 1.0   ;;  %s1878_s0 = inlined_call_operand.vmem [shape: f32[4,256], index: 0, kind: input, shape index: {}]   ;;  %s1879_s1 = inlined_call_operand.vmem [shape: f32[32,4], index: 1, kind: input, shape index: {}]   ;;  %s1880_s2 = inlined_call_operand.vmem [shape: f32[32,1], index: 2, kind: input, shape index: {}]   ;;  %s1881_s3 = inlined_call_operand.vmem [shape: f32[32,32], index: 3, kind: input, shape index: {}]   ;;  %s1882_s4 = inlined_call_operand.vmem [shape: f32[32,1], index: 4, kind: input, shape index: {}]   ;;  %s1883_s5 = inlined_call_operand.vmem [shape: f32[4,32], index: 5, kind: input, shape index: {}]   ;;  %s1884_s6 = inlined_call_operand.vmem [shape: f32[4,1], index: 6, kind: input, shape index: {}]   ;;  %s1885_s7 = inlined_call_operand.hbm [shape: f32[4,256], index: 7, kind: output, shape index: {}]  }
   0x1   :  { %v1591_v0 = vld [vmem:[%s1879_s1] sm:$0xff]  ;;  %v1596_v1 = vld [vmem:[%s1879_s1 + $0x8] sm:$0xff]  ;;  %1283 = vmatprep.subr.msk.mxu0 %vm58_vm0, %v1541_v2  ;;  %v1604_v3 = vld [vmem:[%s1879_s1 + $0x10] sm:$0xff] }
   0x2   :  { %1285 = vmatprep.mubr.msk.f32.mxu0 %vm45_vm1, %v1591_v0 }
   0x3   :  { %12 = vsyncpa [#allocation3], 0  ;;  %1284 = vmatpush3.msk.msra.mxu0 %vm58_vm0, %v1541_v2  ;;  %v1614_v4 = vld [vmem:[%s1879_s1 + $0x18] sm:$0xff]  ;;  %v1621_v5 = vld [vmem:[%s1881_s3] sm:$0xff]  ;;  %vm151_vm2 = vcmask 261120   ;;  %v1542_v27 = vmov 0.0|0.0  }
   0x4   :  { %1286 = vmatmul.mubr.msk.f32.vlgmr.msra.gmra.mrb[0].mxu0 %vm45_vm1, %v1596_v1  ;;  %1299 = vmatprep.mubr.msk.f32.mxu1 %vm151_vm2, %v1621_v5  ;;  %v1628_v6 = vld [vmem:[%s1880_s2 + $0x8] sm:$0xff]  ;;  %v1633_v7 = vld [vmem:[%s1880_s2] sm:$0xff]  ;;  %v1640_v12 = vld [vmem:[%s1880_s2 + $0x18] sm:$0xff]  ;;  %vm1543_vm3 = vmmov 0   ;;  %v1544_v28 = vmov 0.0   ;;  %v1545_v48 = vmov -1.0  }
   0x5   :  { %1288 = vmatprep.mubr.msk.f32.mxu0 %vm45_vm1, %v1604_v3  ;;  %v1645_v13 = vld [vmem:[%s1880_s2 + $0x10] sm:$0xff]  ;;  %v1652_v24 = vld [vmem:[%s1881_s3 + $0x8] sm:$0xff]  ;;  %v1666_v26 = vld [vmem:[%s1881_s3 + $0x18] sm:$0xff]  ;;  %1357 = vmatprep.subr.bf16.mxu0 %v1542_v27  ;;  %v1546_v49 = vmov 0  }
   0x6   :  { %v1657_v25 = vld [vmem:[%s1881_s3 + $0x10] sm:$0xff]  ;;  %v1678_v29 = vld [vmem:[%s1882_s4 + $0x8] sm:$0xff]  ;;  %v1683_v30 = vld [vmem:[%s1882_s4] sm:$0xff]  ;;  %1416 = vset.pattern.permute.xlu0 %v1546_v49  ;;  %1417 = vset.pattern.permute.xlu1 %v1546_v49 }
   0x7   :  { %v1690_v35 = vld [vmem:[%s1882_s4 + $0x18] sm:$0xff]  ;;  %v1695_v36 = vld [vmem:[%s1882_s4 + $0x10] sm:$0xff]  ;;  %v1703_v47 = vld [vmem:[%s1883_s5] sm:$0xf]  ;;  %592 = vperm.xlu0 %1416, %v1633_v7   ;;  %602 = vperm.xlu1 %1417, %v1645_v13  }
   0x8   :  { %1289 = vmatmul.mubr.msk.f32.gmra.mrb[2].mxu0 %vm45_vm1, %v1614_v4  ;;  %v1731_v50 = vld [vmem:[%s1884_s6] sm:$0xf] }
   0x9   :  { %1313 = vmatprep.mubr.msk.f32.mxu0 %vm1543_vm3, %v1544_v28  ;;  %v589_v2 = vld [vmem:[%s1878_s0] sm:$0xff]  ;;  %s1547_s0 = smov [#allocation2]  }
   0xa   :  { %s1196_s10 = sshll.u32 %s1547_s0, 4  ;;  %s1197_s10 = int_to_ptr.vmem [resolvable:$true] %s1196_s10 }
   0xb   :  { %597 = vperm.xlu0 %1416, %v1628_v6   ;;  %607 = vperm.xlu1 %1417, %v1640_v12   ;;  %s1517_s11 = scalar_lea.vmem %s1197_s10, 128  ;;  %p1522_p1 = scmp.lt.s32.totalorder %s1197_s10, %s1197_s10 }
   0xc   :  { %p1518_p0 = scmp.ne.s32.totalorder %s1197_s10, %s1517_s11  ;;  %p1523_p2 = scmp.lt.s32.totalorder %s1517_s11, %s1517_s11 }
   0xe   :  { %p1524_p3 = por %p1523_p2, %p1522_p1 }
   0xf   :  { %715 = vperm.xlu0 %1416, %v1683_v30   ;;  %720 = vperm.xlu1 %1417, %v1678_v29  }
  0x10   :  { %p1525_p4 = pnand %p1524_p3, %p1518_p0 }
  0x13   :  { %725 = vperm.xlu0 %1416, %v1695_v36   ;;  %730 = vperm.xlu1 %1417, %v1690_v35  }
  0x17   :  { %832 = vperm.xlu0 %1416, %v1731_v50  }
  0xd7   :  { %v1287_v8 = vpop.f32.mrb[0].mxu0 }
  0xd8   :  { %v134_v9 = vadd.f32 %v1287_v8, %v1628_v6  ;;  %v128_v10 = vpop.f32.mrb[1].mxu0 }
  0xd9   :  { %v129_v11 = vadd.f32 %v128_v10, %v1633_v7 }
  0xda   :  { %1419 = vtanh.f32 %v134_v9  ;;  %v611_v9 = vcombine.high %v589_v2, %v589_v2 }
  0xdb   :  { %1421 = vtanh.f32 %v129_v11  ;;  %v1290_v14 = vpop.f32.mrb[2].mxu0 }
  0xdc   :  { %v144_v15 = vadd.f32 %v1290_v14, %v1640_v12  ;;  %v138_v16 = vpop.f32.mrb[3].mxu0 }
  0xdd   :  { %v139_v17 = vadd.f32 %v138_v16, %v1645_v13 }
  0xde   :  { %1423 = vtanh.f32 %v144_v15 }
  0xdf   :  { %1425 = vtanh.f32 %v139_v17  ;;  %v1767_v17 = vpop.permute.xlu0 %592 }
  0xe4   :  { %v1420_v18 = vpop.eup %1419 }
  0xe5   :  { %v1422_v19 = vpop.eup %1421 }
  0xe6   :  { %v1349_v20 = vpack.c.bf16 %v1420_v18, %v1422_v19 }
  0xe8   :  { %v1424_v21 = vpop.eup %1423  ;;  %1350 = vmatprep.subr.bf16.mxu1 %v1349_v20 }
  0xe9   :  { %v1426_v22 = vpop.eup %1425  ;;  %1352 = vmatpush3.bf16.msra.mxu1 %v1349_v20 }
  0xea   :  { %v1353_v23 = vpack.c.bf16 %v1424_v21, %v1426_v22 }
  0xec   :  { %1354 = vmatprep.subr.bf16.mxu1 %v1353_v23 }
  0xed   :  { %1356 = vmatpush3.bf16.msra.mxu1 %v1353_v23  ;;  %v1772_v23 = vpop.permute.xlu0 %597 }
  0xf0   :  { %1300 = vmatmul.mubr.msk.f32.vlgmr.msra.gmra.mrb[0].mxu1 %vm151_vm2, %v1652_v24 }
  0xf1   :  { %1302 = vmatprep.mubr.msk.f32.mxu1 %vm151_vm2, %v1657_v25 }
  0xf4   :  { %1303 = vmatmul.mubr.msk.f32.gmra.mrb[2].mxu1 %vm151_vm2, %v1666_v26 }
  0xf5   :  { %1332 = vmatprep.mubr.msk.f32.mxu1 %vm151_vm2, %v1621_v5 }
 0x1c3   :  { %v1301_v31 = vpop.f32.mrb[0].mxu1 }
 0x1c4   :  { %v236_v32 = vadd.f32 %v1301_v31, %v1678_v29  ;;  %v230_v33 = vpop.f32.mrb[1].mxu1 }
 0x1c5   :  { %v231_v34 = vadd.f32 %v230_v33, %v1683_v30 }
 0x1c6   :  { %1427 = vtanh.f32 %v236_v32 }
 0x1c7   :  { %1429 = vtanh.f32 %v231_v34  ;;  %v1304_v37 = vpop.f32.mrb[2].mxu1  ;;  %v1775_v34 = vpop.permute.xlu1 %602 }
 0x1c8   :  { %v246_v38 = vadd.f32 %v1304_v37, %v1690_v35  ;;  %v240_v39 = vpop.f32.mrb[3].mxu1 }
 0x1c9   :  { %v241_v40 = vadd.f32 %v240_v39, %v1695_v36 }
 0x1ca   :  { %1431 = vtanh.f32 %v246_v38 }
 0x1cb   :  { %1433 = vtanh.f32 %v241_v40 }
 0x1d0   :  { %v1428_v41 = vpop.eup %1427 }
 0x1d1   :  { %v1430_v42 = vpop.eup %1429 }
 0x1d2   :  { %v1358_v43 = vpack.c.bf16 %v1428_v41, %v1430_v42 }
 0x1d4   :  { %v1432_v44 = vpop.eup %1431  ;;  %1359 = vmatpush3.bf16.msra.mxu0 %v1358_v43 }
 0x1d5   :  { %v1434_v45 = vpop.eup %1433  ;;  %1360 = vmatprep.subr.bf16.mxu0 %v1542_v27 }
 0x1d6   :  { %v1361_v46 = vpack.c.bf16 %v1432_v44, %v1434_v45  ;;  %v1781_v44 = vpop.permute.xlu1 %607 }
 0x1d8   :  { %1362 = vmatpush3.bf16.msra.mxu0 %v1361_v46 }
 0x1d9   :  { %1316 = vmatprep.subr.msk.mxu0 %vm58_vm0, %v1545_v48 }
 0x1db   :  { %1314 = vmatmul.mubr.msk.f32.vlgmr.msra.gmra.mrb[4].mxu0 %vm151_vm2, %v1703_v47 }
 0x1dc   :  { %1317 = vmatpush3.msk.msra.mxu0 %vm58_vm0, %v1545_v48  ;;  %1318 = vmatprep.mubr.msk.f32.mxu0 %vm45_vm1, %v1591_v0 }
 0x1dd   :  { %1371 = vmatprep.subr.bf16.mxu0 %v1542_v27 }
 0x1df   :  { %1319 = vmatmul.mubr.msk.f32.vlgmr.msra.gmra.mrb[6].mxu0 %vm45_vm1, %v1596_v1 }
 0x1e0   :  { %1321 = vmatprep.mubr.msk.f32.mxu0 %vm45_vm1, %v1604_v3 }
 0x1e3   :  { %1322 = vmatmul.mubr.msk.f32.gmra.mrb[8].mxu0 %vm45_vm1, %v1614_v4 }
 0x1e4   :  { %1346 = vmatprep.mubr.msk.f32.mxu0 %vm1543_vm3, %v1544_v28 }
 0x2ae   :  { %v1734_v51 = vpop.f32.mrb[4].mxu0 }
 0x2af   :  { %v1315_v52 = vpop.f32.mrb[5].mxu0 }
 0x2b2   :  { %v1320_v53 = vpop.f32.mrb[6].mxu0 }
 0x2b3   :  { %v401_v54 = vadd.f32 %v1320_v53, %v1628_v6  ;;  %v395_v55 = vpop.f32.mrb[7].mxu0 }
 0x2b4   :  { %v396_v56 = vadd.f32 %v395_v55, %v1633_v7 }
 0x2b5   :  { %1435 = vtanh.f32 %v401_v54 }
 0x2b6   :  { %1437 = vtanh.f32 %v396_v56  ;;  %v1323_v57 = vpop.f32.mrb[8].mxu0 }
 0x2b7   :  { %v411_v58 = vadd.f32 %v1323_v57, %v1640_v12  ;;  %v405_v59 = vpop.f32.mrb[9].mxu0 }
 0x2b8   :  { %v406_v60 = vadd.f32 %v405_v59, %v1645_v13 }
 0x2b9   :  { %1439 = vtanh.f32 %v411_v58 }
 0x2ba   :  { %1441 = vtanh.f32 %v406_v60 }
 0x2bf   :  { %v1436_v61 = vpop.eup %1435 }
 0x2c0   :  { %v1438_v62 = vpop.eup %1437 }
 0x2c1   :  { %v1363_v63 = vpack.c.bf16 %v1436_v61, %v1438_v62 }
 0x2c3   :  { %v1440_v6 = vpop.eup %1439  ;;  %1364 = vmatprep.subr.bf16.mxu1 %v1363_v63 }
 0x2c4   :  { %v1442_v7 = vpop.eup %1441  ;;  %1366 = vmatpush3.bf16.msra.mxu1 %v1363_v63 }
 0x2c5   :  { %v1367_v8 = vpack.c.bf16 %v1440_v6, %v1442_v7 }
 0x2c7   :  { %1368 = vmatprep.subr.bf16.mxu1 %v1367_v8 }
 0x2c8   :  { %1370 = vmatpush3.bf16.msra.mxu1 %v1367_v8 }
 0x2c9   :  { %1225 = vmatprep.subr.msk.mxu1 %vm58_vm0, %v611_v9 }
 0x2cb   :  { %1333 = vmatmul.mubr.msk.f32.vlgmr.msra.gmra.mrb[4].mxu1 %vm151_vm2, %v1652_v24 }
 0x2cc   :  { %1335 = vmatprep.mubr.msk.f32.mxu1 %vm151_vm2, %v1657_v25  ;;  %1226 = vmatpush1.msk.msra.mxu1 %vm58_vm0, %v589_v2  ;;  %v323_v2 = vadd.f32 %v1734_v51, %v1731_v50 }
 0x2cf   :  { %1336 = vmatmul.mubr.msk.f32.gmra.mrb[6].mxu1 %vm151_vm2, %v1666_v26 }
 0x2d0   :  { %680 = vmatprep.mubr.f32.mxu1 %v1544_v28 }
 0x2d3   :  { %1227 = vmatmul.mubr.msk.f32.vlgmr.msra.gmra.mrb[8].mxu1 %vm45_vm1, %v1591_v0 }
 0x2d4   :  { %686 = vmatprep.mubr.f32.mxu1 %v1544_v28 }
 0x2d7   :  { %1228 = vmatmul.mubr.msk.f32.gmra.mrb[10].mxu1 %vm45_vm1, %v1596_v1 }
 0x2d8   :  { %692 = vmatprep.mubr.f32.mxu1 %v1544_v28 }
 0x2db   :  { %1229 = vmatmul.mubr.msk.f32.gmra.mrb[12].mxu1 %vm45_vm1, %v1604_v3 }
 0x2dc   :  { %698 = vmatprep.mubr.f32.mxu1 %v1544_v28 }
 0x2df   :  { %1230 = vmatmul.mubr.msk.f32.gmra.mrb[14].mxu1 %vm45_vm1, %v1614_v4 }
 0x2e0   :  { %899 = vmatprep.mubr.f32.mxu1 %v1544_v28 }
 0x39e   :  { %v1334_v10 = vpop.f32.mrb[4].mxu1 }
 0x39f   :  { %v490_v11 = vadd.f32 %v1334_v10, %v1678_v29  ;;  %v484_v12 = vpop.f32.mrb[5].mxu1 }
 0x3a0   :  { %v485_v13 = vadd.f32 %v484_v12, %v1683_v30  ;;  %v1804_v12 = vpop.permute.xlu0 %715 }
 0x3a1   :  { %1443 = vtanh.f32 %v490_v11 }
 0x3a2   :  { %1445 = vtanh.f32 %v485_v13  ;;  %v1337_v14 = vpop.f32.mrb[6].mxu1 }
 0x3a3   :  { %v500_v15 = vadd.f32 %v1337_v14, %v1690_v35  ;;  %v494_v16 = vpop.f32.mrb[7].mxu1 }
 0x3a4   :  { %v495_v18 = vadd.f32 %v494_v16, %v1695_v36 }
 0x3a5   :  { %1447 = vtanh.f32 %v500_v15 }
 0x3a6   :  { %1449 = vtanh.f32 %v495_v18  ;;  %v682_v19 = vpop.f32.mrb[8].mxu1 }
 0x3a7   :  { %v683_v20 = vadd.f32 %v682_v19, %v1767_v17  ;;  %v684_v21 = vpop.f32.mrb[9].mxu1  ;;  %v1808_v19 = vpop.permute.xlu1 %720 }
 0x3a8   :  { %v685_v22 = vadd.f32 %v684_v21, %v1767_v17 }
 0x3a9   :  { %1451 = vtanh.f32 %v683_v20 }
 0x3aa   :  { %v688_v29 = vpop.f32.mrb[10].mxu1  ;;  %1453 = vtanh.f32 %v685_v22 }
 0x3ab   :  { %v1444_v30 = vpop.eup %1443  ;;  %v689_v31 = vadd.f32 %v688_v29, %v1772_v23  ;;  %v690_v32 = vpop.f32.mrb[11].mxu1 }
 0x3ac   :  { %v1446_v33 = vpop.eup %1445  ;;  %v691_v35 = vadd.f32 %v690_v32, %v1772_v23  ;;  %v1812_v29 = vpop.permute.xlu0 %725 }
 0x3ad   :  { %1455 = vtanh.f32 %v689_v31  ;;  %v1372_v36 = vpack.c.bf16 %v1444_v30, %v1446_v33 }
 0x3ae   :  { %1457 = vtanh.f32 %v691_v35  ;;  %v694_v37 = vpop.f32.mrb[12].mxu1  ;;  %v1816_v35 = vpop.permute.xlu1 %730 }
 0x3af   :  { %v1448_v38 = vpop.eup %1447  ;;  %v695_v39 = vadd.f32 %v694_v37, %v1775_v34  ;;  %1373 = vmatpush3.bf16.msra.mxu0 %v1372_v36  ;;  %v696_v40 = vpop.f32.mrb[13].mxu1 }
 0x3b0   :  { %v1450_v41 = vpop.eup %1449  ;;  %v697_v42 = vadd.f32 %v696_v40, %v1775_v34  ;;  %1374 = vmatprep.subr.bf16.mxu0 %v1542_v27 }
 0x3b1   :  { %v1375_v43 = vpack.c.bf16 %v1448_v38, %v1450_v41  ;;  %1459 = vtanh.f32 %v695_v39 }
 0x3b2   :  { %v700_v45 = vpop.f32.mrb[14].mxu1  ;;  %1461 = vtanh.f32 %v697_v42 }
 0x3b3   :  { %v701_v46 = vadd.f32 %v700_v45, %v1781_v44  ;;  %1376 = vmatpush3.bf16.msra.mxu0 %v1375_v43  ;;  %v702_v48 = vpop.f32.mrb[15].mxu1  ;;  %v1452_v52 = vpop.eup %1451 }
 0x3b4   :  { %v703_v49 = vadd.f32 %v702_v48, %v1781_v44  ;;  %v1454_v53 = vpop.eup %1453 }
 0x3b5   :  { %1463 = vtanh.f32 %v701_v46 }
 0x3b6   :  { %1465 = vtanh.f32 %v703_v49  ;;  %1347 = vmatmul.mubr.msk.f32.vlgmr.msra.gmra.mrb[10].mxu0 %vm151_vm2, %v1703_v47 }
 0x3b7   :  { %v1456_v27 = vpop.eup %1455  ;;  %797 = vmatprep.mubr.f32.mxu0 %v1544_v28 }
 0x3b8   :  { %v1458_v54 = vpop.eup %1457  ;;  %v1379_v55 = vpack.c.bf16 %v1456_v27, %v1452_v52 }
 0x3b9   :  { %v1377_v56 = vpack.c.bf16 %v1458_v54, %v1454_v53 }
 0x3bb   :  { %1378 = vmatprep.subr.bf16.mxu0 %v1377_v56  ;;  %v1460_v57 = vpop.eup %1459  ;;  %v833_v56 = vpop.permute.xlu0 %832 }
 0x3bc   :  { %1380 = vmatpush1.bf16.msra.mxu0 %v1379_v55  ;;  %v1462_v58 = vpop.eup %1461 }
 0x3bf   :  { %v1464_v59 = vpop.eup %1463 }
 0x3c0   :  { %v1466_v60 = vpop.eup %1465  ;;  %v1383_v61 = vpack.c.bf16 %v1464_v59, %v1460_v57 }
 0x3c1   :  { %v1381_v62 = vpack.c.bf16 %v1466_v60, %v1462_v58 }
 0x3c3   :  { %1382 = vmatprep.subr.bf16.mxu0 %v1381_v62 }
 0x3c4   :  { %1384 = vmatpush1.bf16.msra.mxu0 %v1383_v61 }
 0x3c7   :  { %1231 = vmatmul.mubr.msk.f32.vlgmr.msra.gmra.mrb[12].mxu0 %vm151_vm2, %v1621_v5 }
 0x3c8   :  { %803 = vmatprep.mubr.f32.mxu0 %v1544_v28 }
 0x3cb   :  { %1232 = vmatmul.mubr.msk.f32.gmra.mrb[14].mxu0 %vm151_vm2, %v1652_v24 }
 0x3cc   :  { %809 = vmatprep.mubr.f32.mxu0 %v1544_v28 }
 0x3cf   :  { %1233 = vmatmul.mubr.msk.f32.gmra.mrb[16].mxu0 %vm151_vm2, %v1657_v25 }
 0x3d0   :  { %815 = vmatprep.mubr.f32.mxu0 %v1544_v28 }
 0x3d3   :  { %1234 = vmatmul.mubr.msk.f32.gmra.mrb[18].mxu0 %vm151_vm2, %v1666_v26 }
 0x3d4   :  { %1073 = vmatprep.mubr.f32.mxu0 %v1544_v28 }
 0x489   :  { %v573_v63 = vpop.f32.mrb[10].mxu0 }
 0x48a   :  { %v574_v6 = vadd.f32 %v573_v63, %v1731_v50  ;;  %v1348_v7 = vpop.f32.mrb[11].mxu0 }
 0x48c   :  { %v577_v8 = vsub.f32 %v323_v2, %v574_v6  ;;  %v586_v10 = vsub.f32 %v1731_v50, %v574_v6 }
 0x48e   :  { %1467 = vrcp.f32 %v577_v8 }
 0x498   :  { %v1468_v9 = vpop.eup %1467 }
 0x499   :  { %v579_v11 = vmul.f32 2.0, %v1468_v9 }
 0x49a   :  { %v799_v13 = vpop.f32.mrb[12].mxu0 }
 0x49b   :  { %v800_v14 = vadd.f32 %v799_v13, %v1804_v12  ;;  %582 = vperm.xlu1 %1417, %v579_v11   ;;  %v801_v15 = vpop.f32.mrb[13].mxu0  ;;  %v587_v16 = vmul.f32 %v586_v10, %v579_v11 }
 0x49c   :  { %v802_v18 = vadd.f32 %v801_v15, %v1804_v12 }
 0x49d   :  { %v1224_v51 = vadd.f32 -1.0, %v587_v16  ;;  %1469 = vtanh.f32 %v800_v14 }
 0x49e   :  { %v805_v20 = vpop.f32.mrb[14].mxu0  ;;  %1471 = vtanh.f32 %v802_v18 }
 0x49f   :  { %v806_v21 = vadd.f32 %v805_v20, %v1808_v19  ;;  %1108 = vperm.xlu0 %1416, %v1224_v51   ;;  %v807_v50 = vpop.f32.mrb[15].mxu0 }
 0x4a0   :  { %v808_v22 = vadd.f32 %v807_v50, %v1808_v19 }
 0x4a1   :  { %1473 = vtanh.f32 %v806_v21 }
 0x4a2   :  { %1475 = vtanh.f32 %v808_v22  ;;  %v811_v30 = vpop.f32.mrb[16].mxu0 }
 0x4a3   :  { %v812_v31 = vadd.f32 %v811_v30, %v1812_v29  ;;  %v813_v32 = vpop.f32.mrb[17].mxu0 }
 0x4a4   :  { %v814_v33 = vadd.f32 %v813_v32, %v1812_v29 }
 0x4a5   :  { %1477 = vtanh.f32 %v812_v31 }
 0x4a6   :  { %v817_v36 = vpop.f32.mrb[18].mxu0  ;;  %1479 = vtanh.f32 %v814_v33 }
 0x4a7   :  { %v818_v37 = vadd.f32 %v817_v36, %v1816_v35  ;;  %v819_v38 = vpop.f32.mrb[19].mxu0  ;;  %v1470_v40 = vpop.eup %1469 }
 0x4a8   :  { %v820_v39 = vadd.f32 %v819_v38, %v1816_v35  ;;  %v1472_v41 = vpop.eup %1471 }
 0x4a9   :  { %1481 = vtanh.f32 %v818_v37 }
 0x4aa   :  { %1483 = vtanh.f32 %v820_v39 }
 0x4ab   :  { %v1474_v42 = vpop.eup %1473 }
 0x4ac   :  { %v1476_v43 = vpop.eup %1475  ;;  %v1387_v45 = vpack.c.bf16 %v1474_v42, %v1470_v40 }
 0x4ad   :  { %v1385_v46 = vpack.c.bf16 %v1476_v43, %v1472_v41 }
 0x4af   :  { %1386 = vmatprep.subr.bf16.mxu1 %v1385_v46  ;;  %v1478_v48 = vpop.eup %1477 }
 0x4b0   :  { %1388 = vmatpush1.bf16.msra.mxu1 %v1387_v45  ;;  %v1480_v49 = vpop.eup %1479 }
 0x4b3   :  { %v1482_v52 = vpop.eup %1481 }
 0x4b4   :  { %v1484_v53 = vpop.eup %1483  ;;  %v1391_v27 = vpack.c.bf16 %v1482_v52, %v1478_v48 }
 0x4b5   :  { %v1389_v54 = vpack.c.bf16 %v1484_v53, %v1480_v49 }
 0x4b7   :  { %1390 = vmatprep.subr.bf16.mxu1 %v1389_v54 }
 0x4b8   :  { %1392 = vmatpush1.bf16.msra.mxu1 %v1391_v27 }
 0x4bb   :  { %1235 = vmatmul.mubr.msk.f32.vlgmr.msra.gmra.mrb[16].mxu1 %vm151_vm2, %v1703_v47 }
 0x4bc   :  { %976 = vmatprep.mubr.f32.mxu1 %v1544_v28 }
 0x51a   :  { %v583_v54 = vpop.permute.xlu1 %582 }
 0x58e   :  { %v901_v55 = vpop.f32.mrb[16].mxu1 }
 0x58f   :  { %v903_v57 = vpop.f32.mrb[17].mxu1  ;;  %v902_v59 = vadd.f32 %v901_v55, %v833_v56  ;;  %v1109_v55 = vpop.permute.xlu0 %1108 }
 0x590   :  { %v904_v58 = vadd.f32 %v903_v57, %v833_v56 }
 0x592   :  { %1236 = vmatprep.subr.msk.mxu1 %vm58_vm0, %v904_v58 }
 0x593   :  { %1237 = vmatpush1.msk.msra.mxu1 %vm58_vm0, %v902_v59 }
 0x594   :  { %1238 = vmatmul.mubr.msk.f32.vlgmr.msra.gmra.mrb[18].mxu1 %vm45_vm1, %v1591_v0 }
 0x595   :  { %982 = vmatprep.mubr.f32.mxu1 %v1544_v28 }
 0x598   :  { %1239 = vmatmul.mubr.msk.f32.gmra.mrb[20].mxu1 %vm45_vm1, %v1596_v1 }
 0x599   :  { %988 = vmatprep.mubr.f32.mxu1 %v1544_v28 }
 0x59c   :  { %1240 = vmatmul.mubr.msk.f32.gmra.mrb[22].mxu1 %vm45_vm1, %v1604_v3 }
 0x59d   :  { %994 = vmatprep.mubr.f32.mxu1 %v1544_v28 }
 0x5a0   :  { %1241 = vmatmul.mubr.msk.f32.gmra.mrb[24].mxu1 %vm45_vm1, %v1614_v4 }
 0x5a1   :  { %1178 = vmatprep.mubr.f32.mxu1 %v1544_v28 }
 0x667   :  { %v978_v60 = vpop.f32.mrb[18].mxu1 }
 0x668   :  { %v979_v0 = vadd.f32 %v978_v60, %v1767_v17  ;;  %v980_v61 = vpop.f32.mrb[19].mxu1 }
 0x669   :  { %v981_v62 = vadd.f32 %v980_v61, %v1767_v17 }
 0x66a   :  { %1485 = vtanh.f32 %v979_v0 }
 0x66b   :  { %v984_v63 = vpop.f32.mrb[20].mxu1  ;;  %1487 = vtanh.f32 %v981_v62 }
 0x66c   :  { %v985_v1 = vadd.f32 %v984_v63, %v1772_v23  ;;  %v986_v2 = vpop.f32.mrb[21].mxu1 }
 0x66d   :  { %v987_v3 = vadd.f32 %v986_v2, %v1772_v23 }
 0x66e   :  { %1489 = vtanh.f32 %v985_v1 }
 0x66f   :  { %1491 = vtanh.f32 %v987_v3  ;;  %v990_v6 = vpop.f32.mrb[22].mxu1 }
 0x670   :  { %v991_v4 = vadd.f32 %v990_v6, %v1775_v34  ;;  %v992_v7 = vpop.f32.mrb[23].mxu1 }
 0x671   :  { %v993_v8 = vadd.f32 %v992_v7, %v1775_v34 }
 0x672   :  { %1493 = vtanh.f32 %v991_v4 }
 0x673   :  { %v996_v9 = vpop.f32.mrb[24].mxu1  ;;  %1495 = vtanh.f32 %v993_v8 }
 0x674   :  { %v997_v17 = vadd.f32 %v996_v9, %v1781_v44  ;;  %v998_v10 = vpop.f32.mrb[25].mxu1  ;;  %v1486_v13 = vpop.eup %1485 }
 0x675   :  { %v999_v11 = vadd.f32 %v998_v10, %v1781_v44  ;;  %v1488_v14 = vpop.eup %1487 }
 0x676   :  { %1497 = vtanh.f32 %v997_v17 }
 0x677   :  { %1499 = vtanh.f32 %v999_v11 }
 0x678   :  { %v1490_v23 = vpop.eup %1489 }
 0x679   :  { %v1492_v15 = vpop.eup %1491  ;;  %v1395_v16 = vpack.c.bf16 %v1490_v23, %v1486_v13 }
 0x67a   :  { %v1393_v18 = vpack.c.bf16 %v1492_v15, %v1488_v14 }
 0x67c   :  { %1394 = vmatprep.subr.bf16.mxu0 %v1393_v18  ;;  %v1494_v51 = vpop.eup %1493 }
 0x67d   :  { %1396 = vmatpush1.bf16.msra.mxu0 %v1395_v16  ;;  %v1496_v34 = vpop.eup %1495 }
 0x680   :  { %v1498_v20 = vpop.eup %1497 }
 0x681   :  { %v1500_v21 = vpop.eup %1499  ;;  %v1399_v50 = vpack.c.bf16 %v1498_v20, %v1494_v51 }
 0x682   :  { %v1397_v22 = vpack.c.bf16 %v1500_v21, %v1496_v34 }
 0x684   :  { %1398 = vmatprep.subr.bf16.mxu0 %v1397_v22 }
 0x685   :  { %1400 = vmatpush1.bf16.msra.mxu0 %v1399_v50 }
 0x688   :  { %1242 = vmatmul.mubr.msk.f32.vlgmr.msra.gmra.mrb[20].mxu0 %vm151_vm2, %v1621_v5 }
 0x689   :  { %1079 = vmatprep.mubr.f32.mxu0 %v1544_v28 }
 0x68c   :  { %1243 = vmatmul.mubr.msk.f32.gmra.mrb[22].mxu0 %vm151_vm2, %v1652_v24 }
 0x68d   :  { %1085 = vmatprep.mubr.f32.mxu0 %v1544_v28 }
 0x690   :  { %1244 = vmatmul.mubr.msk.f32.gmra.mrb[24].mxu0 %vm151_vm2, %v1657_v25 }
 0x691   :  { %1091 = vmatprep.mubr.f32.mxu0 %v1544_v28 }
 0x694   :  { %1245 = vmatmul.mubr.msk.f32.gmra.mrb[26].mxu0 %vm151_vm2, %v1666_v26 }
 0x75b   :  { %v1075_v44 = vpop.f32.mrb[20].mxu0 }
 0x75c   :  { %v1076_v30 = vadd.f32 %v1075_v44, %v1804_v12  ;;  %v1077_v31 = vpop.f32.mrb[21].mxu0 }
 0x75d   :  { %v1078_v5 = vadd.f32 %v1077_v31, %v1804_v12 }
 0x75e   :  { %1501 = vtanh.f32 %v1076_v30 }
 0x75f   :  { %v1081_v32 = vpop.f32.mrb[22].mxu0  ;;  %1503 = vtanh.f32 %v1078_v5 }
 0x760   :  { %v1082_v24 = vadd.f32 %v1081_v32, %v1808_v19  ;;  %v1083_v33 = vpop.f32.mrb[23].mxu0 }
 0x761   :  { %v1084_v36 = vadd.f32 %v1083_v33, %v1808_v19 }
 0x762   :  { %1505 = vtanh.f32 %v1082_v24 }
 0x763   :  { %1507 = vtanh.f32 %v1084_v36  ;;  %v1087_v25 = vpop.f32.mrb[24].mxu0 }
 0x764   :  { %v1088_v28 = vadd.f32 %v1087_v25, %v1812_v29  ;;  %v1089_v26 = vpop.f32.mrb[25].mxu0 }
 0x765   :  { %v1090_v37 = vadd.f32 %v1089_v26, %v1812_v29 }
 0x766   :  { %1509 = vtanh.f32 %v1088_v28 }
 0x767   :  { %v1093_v38 = vpop.f32.mrb[26].mxu0  ;;  %1511 = vtanh.f32 %v1090_v37 }
 0x768   :  { %v1094_v12 = vadd.f32 %v1093_v38, %v1816_v35  ;;  %v1095_v39 = vpop.f32.mrb[27].mxu0  ;;  %v1502_v41 = vpop.eup %1501 }
 0x769   :  { %v1096_v40 = vadd.f32 %v1095_v39, %v1816_v35  ;;  %v1504_v42 = vpop.eup %1503  ;;  %v585_v35 = vmul.f32 %v583_v54, %v1703_v47 }
 0x76a   :  { %1513 = vtanh.f32 %v1094_v12 }
 0x76b   :  { %1515 = vtanh.f32 %v1096_v40 }
 0x76c   :  { %v1506_v19 = vpop.eup %1505 }
 0x76d   :  { %v1508_v43 = vpop.eup %1507  ;;  %v1403_v45 = vpack.c.bf16 %v1506_v19, %v1502_v41 }
 0x76e   :  { %v1401_v46 = vpack.c.bf16 %v1508_v43, %v1504_v42 }
 0x770   :  { %1402 = vmatprep.subr.bf16.mxu1 %v1401_v46  ;;  %v1510_v48 = vpop.eup %1509 }
 0x771   :  { %1404 = vmatpush1.bf16.msra.mxu1 %v1403_v45  ;;  %v1512_v29 = vpop.eup %1511 }
 0x774   :  { %v1514_v49 = vpop.eup %1513 }
 0x775   :  { %v1516_v52 = vpop.eup %1515  ;;  %v1407_v53 = vpack.c.bf16 %v1514_v49, %v1510_v48 }
 0x776   :  { %v1405_v27 = vpack.c.bf16 %v1516_v52, %v1512_v29 }
 0x778   :  { %1406 = vmatprep.subr.bf16.mxu1 %v1405_v27 }
 0x779   :  { %1408 = vmatpush1.bf16.msra.mxu1 %v1407_v53 }
 0x77c   :  { %1246 = vmatmul.mubr.msk.f32.vlgmr.msra.gmra.mrb[26].mxu1 %vm151_vm2, %v585_v35 }
 0x84f   :  { %v1180_v56 = vpop.f32.mrb[26].mxu1 }
 0x850   :  { %v1181_v57 = vadd.f32 %v1180_v56, %v1109_v55  ;;  %v1182_v58 = vpop.f32.mrb[27].mxu1 }
 0x851   :  { %v1183_v59 = vadd.f32 %v1182_v58, %v1109_v55 }
 0x853   :  { %v1187_v60 = vcombine.low %v1181_v57, %v1183_v59 }
 0x855   :  { %1189 = vst [vmem:[#allocation2] sm:$0xff] %v1187_v60 }
 0x856   :  { %1528 = shalt.err (!%p1525_p4)
}
 0x857   :  { %s1529_s1 = scalar_lea.hbm %s1885_s7, 128 }
 0x858   :  { %p1530_p5 = scmp.ne.s32.totalorder %s1885_s7, %s1529_s1  ;;  %p1533_p6 = scmp.lt.u32.totalorder %s1529_s1, %s1885_s7 }
 0x85a   :  { %p1535_p7 = pnand %p1533_p6, %p1530_p5 }
 0x85c   :  { %1538 = shalt.err (!%p1535_p7)
}
 0x85d   :  { %1199 = dma.vmem_to_hbm [thread:$0]  %s1197_s10, 128, %s1885_s7, [#allocation3]  }
 0x85e   :  { %1539 = dma.done.wait [#allocation3], 128  }
 0x85f   :  { %1540 = vsyncadd [#allocation3], 4294967168 }
 0x860   :  { %1203 = vsyncpa [#allocation3], 1 }

</bundles_post_ra>
